<compile_context>
chip_gen: v7x
topology: tpu7x:2x2x1
jax: 0.10.0
libtpu: 0.0.40
codegen_flags: <defaults>
</compile_context>

<pallas_src>
import jax
import jax.numpy as jnp
from jax import lax
from jax.experimental import pallas as pl
from jax.experimental.pallas import tpu as pltpu


def rnn_kernel(x_ref, whh_ref, hxbh_ref, proj_ref, out_ref):
    """Entire RNN forward in one invocation.

    x_ref:    (T, B)    input, time-major (batch on the lane axis)
    whh_ref:  (H, H)    hidden->hidden weights
    hxbh_ref: (2, H)    row 0 = W_hx (input_dim == 1), row 1 = b_h
    proj_ref: (H+1, O)  rows 0..H-1 = W_ph, row H = b_o
    out_ref:  (B, O)    output
    """
    T, B = x_ref.shape
    H = whh_ref.shape[0]

    whh = whh_ref[...]                 # (H, H)
    whx = hxbh_ref[0:1, :]             # (1, H)
    bh = hxbh_ref[1:2, :]              # (1, H)

    # Precompute the input + bias contribution for every timestep OFF the critical
    # path:  pre_in[t, b, :] = x[t, b] * W_hx + b_h   (one vectorized VPU op).
    x_tb = x_ref[...]                                            # (T, B)
    pre_in = x_tb[:, :, None] * whx[None, :, :] + bh[None, :, :]  # (T, B, H)

    # h_0 = 0.  The serial chain is now only: dot -> add -> tanh per step.
    h = jnp.zeros((B, H), jnp.float32)

    if T <= 32:
        # Small T: full static unroll; every pre_in[t] slice is a free static
        # leading-dim select, and the scheduler sees the whole dependence chain.
        for t in range(T):
            h = jnp.tanh(
                pre_in[t] + jnp.dot(h, whh, preferred_element_type=jnp.float32)
            )
    else:
        # TODO(synk): for very long T, stream pre_in (or x) per chunk instead of
        # materializing the full (T, B, H) block in vregs.
        def body(t, h_carry):
            return jnp.tanh(
                pre_in[t] + jnp.dot(h_carry, whh, preferred_element_type=jnp.float32)
            )

        h = lax.fori_loop(0, T, body, h, unroll=8)

    # Fused output projection (O is tiny; a single masked store is noise here).
    wph = proj_ref[:H, :]              # (H, O)
    bo = proj_ref[H : H + 1, :]        # (1, O)
    out_ref[...] = jnp.dot(h, wph, preferred_element_type=jnp.float32) + bo


def vanilla_rnn_forward(x, W_hx, W_hh, W_ph, b_h, b_o):
    """x: (batch, seq_length) float32. Returns (batch, output_dim) float32."""
    B, T = x.shape
    I, H = W_hx.shape
    O = W_ph.shape[1]
    assert I == 1, "forward implies input_dim == 1 (x[:, t:t+1] @ W_hx)"

    f32 = jnp.float32
    # Layout plumbing / descriptor packing (pure reshapes & concats, no compute):
    x_tb = x.astype(f32).T                                             # (T, B)
    hxbh = jnp.concatenate(
        [W_hx.astype(f32), b_h.reshape(1, H).astype(f32)], axis=0
    )                                                                   # (2, H)
    proj = jnp.concatenate(
        [W_ph.astype(f32), b_o.reshape(1, O).astype(f32)], axis=0
    )                                                                   # (H+1, O)

    vmem = pl.BlockSpec(memory_space=pltpu.MemorySpace.VMEM)  # full array in VMEM

    out = pl.pallas_call(
        rnn_kernel,
        out_shape=jax.ShapeDtypeStruct((B, O), f32),
        in_specs=[vmem] * 4,
        out_specs=vmem,
    )(x_tb, W_hh.astype(f32), hxbh, proj)
    return out


def ref_forward(x, W_hx, W_hh, W_ph, b_h, b_o):
    """Pure-JAX reference matching the PyTorch forward exactly (f32 math)."""
    B, T = x.shape
    H = W_hh.shape[0]
    hp = jax.lax.Precision.HIGHEST
    h = jnp.zeros((B, H), jnp.float32)
    for t in range(T):
        h = jnp.tanh(
            jnp.dot(x[:, t : t + 1], W_hx, precision=hp)
            + jnp.dot(h, W_hh, precision=hp)
            + b_h
        )
    return jnp.dot(h, W_ph, precision=hp) + b_o


if __name__ == "__main__":
    # Module hyperparameters (small, consistent with the forward pass).
    seq_length = 8
    input_dim = 1        # implied by x[:, t:t+1] @ W_hx in the PyTorch forward
    hidden_dim = 32
    output_dim = 4
    batch_size = 8

    key = jax.random.PRNGKey(0)
    k_x, k_whx, k_whh, k_wph, k_bh, k_bo = jax.random.split(key, 6)

    # Deterministic parameter init (torch.randn analogue).
    W_hx = jax.random.normal(k_whx, (input_dim, hidden_dim), jnp.float32)
    W_hh = jax.random.normal(k_whh, (hidden_dim, hidden_dim), jnp.float32)
    W_ph = jax.random.normal(k_wph, (hidden_dim, output_dim), jnp.float32)
    b_h = jax.random.normal(k_bh, (hidden_dim,), jnp.float32)
    b_o = jax.random.normal(k_bo, (output_dim,), jnp.float32)

    x = jax.random.normal(k_x, (batch_size, seq_length), jnp.float32)

    out = vanilla_rnn_forward(x, W_hx, W_hh, W_ph, b_h, b_o)
    out = jax.block_until_ready(out)

    ref = ref_forward(x, W_hx, W_hh, W_ph, b_h, b_o)
    assert out.shape == (batch_size, output_dim)

    # Tolerance leaves headroom for MXU-pass rounding compounded through the 8-step
    # tanh recurrence (exact in interpret mode; ~f32 on hardware).
    max_err = float(jnp.max(jnp.abs(out - ref)))
    assert jnp.allclose(out, ref, rtol=2e-3, atol=2e-3), (
        f"mismatch vs reference (max abs err = {max_err})"
    )

    print("KERNEL_OK")
</pallas_src>

<mosaic_0001>
module attributes {stable_mosaic.version = 11 : i64} {
  func.func @rnn_kernel(%arg0: memref<8x8xf32, #tpu.memory_space<vmem>>, %arg1: memref<32x32xf32, #tpu.memory_space<vmem>>, %arg2: memref<2x32xf32, #tpu.memory_space<vmem>>, %arg3: memref<33x4xf32, #tpu.memory_space<vmem>>, %arg4: memref<8x4xf32, #tpu.memory_space<vmem>>) attributes {dimension_semantics = [], scalar_prefetch = 0 : i64, scratch_operands = 0 : i64, tpu.core_type = #tpu.core_type<tc>} {
    %c0 = arith.constant 0 : index
    %c0_0 = arith.constant 0 : index
    %0 = vector.load %arg1[%c0, %c0_0] : memref<32x32xf32, #tpu.memory_space<vmem>>, vector<32x32xf32>
    %c0_1 = arith.constant 0 : index
    %c0_2 = arith.constant 0 : index
    %1 = vector.load %arg2[%c0_1, %c0_2] : memref<2x32xf32, #tpu.memory_space<vmem>>, vector<1x32xf32>
    %c1 = arith.constant 1 : index
    %c0_3 = arith.constant 0 : index
    %2 = vector.load %arg2[%c1, %c0_3] : memref<2x32xf32, #tpu.memory_space<vmem>>, vector<1x32xf32>
    %c0_4 = arith.constant 0 : index
    %c0_5 = arith.constant 0 : index
    %3 = vector.load %arg0[%c0_4, %c0_5] : memref<8x8xf32, #tpu.memory_space<vmem>>, vector<8x8xf32>
    %4 = vector.shape_cast %3 : vector<8x8xf32> to vector<8x8x1xf32>
    %5 = vector.shape_cast %1 : vector<1x32xf32> to vector<1x1x32xf32>
    %6 = vector.broadcast %4 : vector<8x8x1xf32> to vector<8x8x32xf32>
    %7 = vector.broadcast %5 : vector<1x1x32xf32> to vector<8x8x32xf32>
    %8 = arith.mulf %6, %7 : vector<8x8x32xf32>
    %9 = vector.shape_cast %2 : vector<1x32xf32> to vector<1x1x32xf32>
    %10 = vector.broadcast %9 : vector<1x1x32xf32> to vector<8x8x32xf32>
    %11 = arith.addf %8, %10 : vector<8x8x32xf32>
    %cst = arith.constant 0.000000e+00 : f32
    %12 = vector.broadcast %cst : f32 to vector<8x32xf32>
    %13 = vector.extract_strided_slice %11 {offsets = [0, 0, 0], sizes = [1, 8, 32], strides = [1, 1, 1]} : vector<8x8x32xf32> to vector<1x8x32xf32>
    %14 = vector.shape_cast %13 : vector<1x8x32xf32> to vector<8x32xf32>
    %cst_6 = arith.constant dense<0.000000e+00> : vector<8x32xf32>
    %15 = tpu.matmul %12, %0, %cst_6 {dimension_numbers = #tpu.dot_dimension_numbers<[1], [0], [0], [1], [0, 0, 1, 1], [], []>} : vector<8x32xf32>, vector<32x32xf32>, vector<8x32xf32> -> vector<8x32xf32>
    %16 = arith.addf %14, %15 : vector<8x32xf32>
    %17 = math.tanh %16 : vector<8x32xf32>
    %18 = vector.extract_strided_slice %11 {offsets = [1, 0, 0], sizes = [1, 8, 32], strides = [1, 1, 1]} : vector<8x8x32xf32> to vector<1x8x32xf32>
    %19 = vector.shape_cast %18 : vector<1x8x32xf32> to vector<8x32xf32>
    %cst_7 = arith.constant dense<0.000000e+00> : vector<8x32xf32>
    %20 = tpu.matmul %17, %0, %cst_7 {dimension_numbers = #tpu.dot_dimension_numbers<[1], [0], [0], [1], [0, 0, 1, 1], [], []>} : vector<8x32xf32>, vector<32x32xf32>, vector<8x32xf32> -> vector<8x32xf32>
    %21 = arith.addf %19, %20 : vector<8x32xf32>
    %22 = math.tanh %21 : vector<8x32xf32>
    %23 = vector.extract_strided_slice %11 {offsets = [2, 0, 0], sizes = [1, 8, 32], strides = [1, 1, 1]} : vector<8x8x32xf32> to vector<1x8x32xf32>
    %24 = vector.shape_cast %23 : vector<1x8x32xf32> to vector<8x32xf32>
    %cst_8 = arith.constant dense<0.000000e+00> : vector<8x32xf32>
    %25 = tpu.matmul %22, %0, %cst_8 {dimension_numbers = #tpu.dot_dimension_numbers<[1], [0], [0], [1], [0, 0, 1, 1], [], []>} : vector<8x32xf32>, vector<32x32xf32>, vector<8x32xf32> -> vector<8x32xf32>
    %26 = arith.addf %24, %25 : vector<8x32xf32>
    %27 = math.tanh %26 : vector<8x32xf32>
    %28 = vector.extract_strided_slice %11 {offsets = [3, 0, 0], sizes = [1, 8, 32], strides = [1, 1, 1]} : vector<8x8x32xf32> to vector<1x8x32xf32>
    %29 = vector.shape_cast %28 : vector<1x8x32xf32> to vector<8x32xf32>
    %cst_9 = arith.constant dense<0.000000e+00> : vector<8x32xf32>
    %30 = tpu.matmul %27, %0, %cst_9 {dimension_numbers = #tpu.dot_dimension_numbers<[1], [0], [0], [1], [0, 0, 1, 1], [], []>} : vector<8x32xf32>, vector<32x32xf32>, vector<8x32xf32> -> vector<8x32xf32>
    %31 = arith.addf %29, %30 : vector<8x32xf32>
    %32 = math.tanh %31 : vector<8x32xf32>
    %33 = vector.extract_strided_slice %11 {offsets = [4, 0, 0], sizes = [1, 8, 32], strides = [1, 1, 1]} : vector<8x8x32xf32> to vector<1x8x32xf32>
    %34 = vector.shape_cast %33 : vector<1x8x32xf32> to vector<8x32xf32>
    %cst_10 = arith.constant dense<0.000000e+00> : vector<8x32xf32>
    %35 = tpu.matmul %32, %0, %cst_10 {dimension_numbers = #tpu.dot_dimension_numbers<[1], [0], [0], [1], [0, 0, 1, 1], [], []>} : vector<8x32xf32>, vector<32x32xf32>, vector<8x32xf32> -> vector<8x32xf32>
    %36 = arith.addf %34, %35 : vector<8x32xf32>
    %37 = math.tanh %36 : vector<8x32xf32>
    %38 = vector.extract_strided_slice %11 {offsets = [5, 0, 0], sizes = [1, 8, 32], strides = [1, 1, 1]} : vector<8x8x32xf32> to vector<1x8x32xf32>
    %39 = vector.shape_cast %38 : vector<1x8x32xf32> to vector<8x32xf32>
    %cst_11 = arith.constant dense<0.000000e+00> : vector<8x32xf32>
    %40 = tpu.matmul %37, %0, %cst_11 {dimension_numbers = #tpu.dot_dimension_numbers<[1], [0], [0], [1], [0, 0, 1, 1], [], []>} : vector<8x32xf32>, vector<32x32xf32>, vector<8x32xf32> -> vector<8x32xf32>
    %41 = arith.addf %39, %40 : vector<8x32xf32>
    %42 = math.tanh %41 : vector<8x32xf32>
    %43 = vector.extract_strided_slice %11 {offsets = [6, 0, 0], sizes = [1, 8, 32], strides = [1, 1, 1]} : vector<8x8x32xf32> to vector<1x8x32xf32>
    %44 = vector.shape_cast %43 : vector<1x8x32xf32> to vector<8x32xf32>
    %cst_12 = arith.constant dense<0.000000e+00> : vector<8x32xf32>
    %45 = tpu.matmul %42, %0, %cst_12 {dimension_numbers = #tpu.dot_dimension_numbers<[1], [0], [0], [1], [0, 0, 1, 1], [], []>} : vector<8x32xf32>, vector<32x32xf32>, vector<8x32xf32> -> vector<8x32xf32>
    %46 = arith.addf %44, %45 : vector<8x32xf32>
    %47 = math.tanh %46 : vector<8x32xf32>
    %48 = vector.extract_strided_slice %11 {offsets = [7, 0, 0], sizes = [1, 8, 32], strides = [1, 1, 1]} : vector<8x8x32xf32> to vector<1x8x32xf32>
    %49 = vector.shape_cast %48 : vector<1x8x32xf32> to vector<8x32xf32>
    %cst_13 = arith.constant dense<0.000000e+00> : vector<8x32xf32>
    %50 = tpu.matmul %47, %0, %cst_13 {dimension_numbers = #tpu.dot_dimension_numbers<[1], [0], [0], [1], [0, 0, 1, 1], [], []>} : vector<8x32xf32>, vector<32x32xf32>, vector<8x32xf32> -> vector<8x32xf32>
    %51 = arith.addf %49, %50 : vector<8x32xf32>
    %52 = math.tanh %51 : vector<8x32xf32>
    %c0_14 = arith.constant 0 : index
    %c0_15 = arith.constant 0 : index
    %53 = vector.load %arg3[%c0_14, %c0_15] : memref<33x4xf32, #tpu.memory_space<vmem>>, vector<32x4xf32>
    %c32 = arith.constant 32 : index
    %c0_16 = arith.constant 0 : index
    %54 = vector.load %arg3[%c32, %c0_16] : memref<33x4xf32, #tpu.memory_space<vmem>>, vector<1x4xf32>
    %cst_17 = arith.constant dense<0.000000e+00> : vector<8x4xf32>
    %55 = tpu.matmul %52, %53, %cst_17 {dimension_numbers = #tpu.dot_dimension_numbers<[1], [0], [0], [1], [0, 0, 1, 1], [], []>} : vector<8x32xf32>, vector<32x4xf32>, vector<8x4xf32> -> vector<8x4xf32>
    %56 = vector.broadcast %54 : vector<1x4xf32> to vector<8x4xf32>
    %57 = arith.addf %55, %56 : vector<8x4xf32>
    %c0_18 = arith.constant 0 : index
    %c0_19 = arith.constant 0 : index
    %58 = vector.load %arg4[%c0_18, %c0_19] : memref<8x4xf32, #tpu.memory_space<vmem>>, vector<8x4xf32>
    tpu.vector_store %arg4[%c0_18, %c0_19], %57 {strides = array<i32>} : memref<8x4xf32, #tpu.memory_space<vmem>>, vector<8x4xf32>,
    return
  }
}

</mosaic_0001>

<bundles_post_ra>
// kernel: tpu_custom_call.1
= control target key start
LH: loop header
LB: loop body
LE: loop exit
PB: predicated region body
PF: predicated region fallthrough
CT: control target
= control target key end

     0   :  { %v24_v0 = vlaneseq  ;;  %v1021_v1 = vmov 0.0|0.0   ;;  %vm1022_vm0 = vmmov 0   ;;  %v1023_v5 = vmov 0.0   ;;  %s1193_s1 = inlined_call_operand.vmem [shape: f32[32,32], index: 1, kind: input, shape index: {}]   ;;  %s1194_s0 = inlined_call_operand.vmem [shape: f32[8,8], index: 0, kind: input, shape index: {}]   ;;  %s1195_s2 = inlined_call_operand.vmem [shape: f32[2,32], index: 2, kind: input, shape index: {}]   ;;  %s1196_s3 = inlined_call_operand.vmem [shape: f32[33,4], index: 3, kind: input, shape index: {}]   ;;  %s1197_s4 = inlined_call_operand.vmem [shape: f32[8,4], index: 4, kind: output, shape index: {}]  }
   0x1   :  { %948 = vmatprep.subr.bf16.mxu0 %v1021_v1  ;;  %v17_v2 = vld [vmem:[%s1193_s1] sm:$0xff]  ;;  %v18_v3 = vld [vmem:[%s1193_s1 + $0x8] sm:$0xff]  ;;  %v19_v4 = vld [vmem:[%s1193_s1 + $0x10] sm:$0xff]  ;;  %857 = vmatprep.mubr.msk.f32.mxu0 %vm1022_vm0, %v1023_v5  ;;  %vm104_vm1 = vcmask 261120   ;;  %vm787_vm2 = vcmask 31744  }
   0x2   :  { %v1061_v6 = vpack.c.bf16 %v18_v3, %v17_v2  ;;  %v20_v7 = vld [vmem:[%s1193_s1 + $0x18] sm:$0xff]  ;;  %v1066_v8 = vshrl.u32 %v24_v0, 7  ;;  %954 = vmatprep.subr.bf16.mxu1 %v1021_v1  ;;  %868 = vmatprep.mubr.msk.f32.mxu1 %vm1022_vm0, %v1023_v5  ;;  %v1074_v9 = vld [vmem:[%s1194_s0] sm:$0xff] }
   0x3   :  { %v1077_v10 = vpack.c.bf16 %v20_v7, %v19_v4  ;;  %v1100_v15 = vld [vmem:[%s1195_s2] ss:$0 sm:$0xff]  ;;  %v1106_v18 = vld [vmem:[%s1195_s2 + $0x1] ss:$0 sm:$0xff] }
   0x4   :  { %950 = vmatpush3.bf16.msra.mxu0 %v1061_v6  ;;  %v26_v11 = vsub.s32 0, %v1066_v8  ;;  %956 = vmatpush3.bf16.msra.mxu1 %v1061_v6  ;;  %v33_v13 = vsub.s32 1, %v1066_v8  ;;  %v40_v24 = vsub.s32 2, %v1066_v8  ;;  %v47_v33 = vsub.s32 3, %v1066_v8 }
   0x5   :  { %951 = vmatprep.subr.bf16.mxu0 %v1021_v1  ;;  %957 = vmatprep.subr.bf16.mxu1 %v1021_v1  ;;  %v54_v42 = vsub.s32 4, %v1066_v8  ;;  %v61_v51 = vsub.s32 5, %v1066_v8  ;;  %v68_v60 = vsub.s32 6, %v1066_v8  ;;  %v75_v7 = vsub.s32 7, %v1066_v8  ;;  %v706_v8 = vld [vmem:[%s1196_s3 + $0x8] sm:$0xff] }
   0x6   :  { %v27_v12 = vrot.slane %v1074_v9, %v26_v11  ;;  %v34_v14 = vrot.slane %v1074_v9, %v33_v13  ;;  %v41_v25 = vrot.slane %v1074_v9, %v40_v24  ;;  %v48_v34 = vrot.slane %v1074_v9, %v47_v33 }
   0x7   :  { %v55_v43 = vrot.slane %v1074_v9, %v54_v42  ;;  %v62_v52 = vrot.slane %v1074_v9, %v61_v51  ;;  %v69_v61 = vrot.slane %v1074_v9, %v68_v60 }
   0x8   :  { %953 = vmatpush3.bf16.msra.mxu0 %v1077_v10  ;;  %29 = vbcast.lane.b32.xlu0 %v27_v12, 256 }
   0x9   :  { %959 = vmatpush3.bf16.msra.mxu1 %v1077_v10  ;;  %960 = vmatprep.subr.bf16.mxu0 %v1021_v1 }
   0xa   :  { %966 = vmatprep.subr.bf16.mxu1 %v1021_v1  ;;  %43 = vbcast.lane.b32.xlu1 %v41_v25, 256 }
   0xb   :  { %858 = vmatmul.mubr.f32.vlgmr.msra.gmra.mrb[0].mxu0 %v1023_v5 }
   0xc   :  { %962 = vmatpush3.bf16.msra.mxu0 %v1061_v6  ;;  %879 = vmatprep.mubr.msk.f32.mxu0 %vm1022_vm0, %v1023_v5 }
   0xd   :  { %963 = vmatprep.subr.bf16.mxu0 %v1021_v1  ;;  %36 = vbcast.lane.b32.xlu0 %v34_v14, 256 }
   0xe   :  { %50 = vbcast.lane.b32.xlu1 %v48_v34, 256 }
  0x10   :  { %965 = vmatpush3.bf16.msra.mxu0 %v1077_v10 }
  0x11   :  { %972 = vmatprep.subr.bf16.mxu0 %v1021_v1  ;;  %57 = vbcast.lane.b32.xlu0 %v55_v43, 256 }
  0x12   :  { %64 = vbcast.lane.b32.xlu1 %v62_v52, 256 }
  0x15   :  { %71 = vbcast.lane.b32.xlu0 %v69_v61, 256 }
  0x7a   :  { %v30_v16 = vpop.permute.xlu0 %29 }
  0x7b   :  { %v84_v17 = vmul.f32 %v1100_v15, %v30_v16 }
  0x7c   :  { %v44_v35 = vpop.permute.xlu1 %43 }
  0x7d   :  { %v96_v19 = vadd.f32 %v1106_v18, %v84_v17  ;;  %v86_v36 = vmul.f32 %v1100_v15, %v44_v35 }
  0x7f   :  { %v37_v26 = vpop.permute.xlu0 %36  ;;  %v98_v37 = vadd.f32 %v1106_v18, %v86_v36 }
  0x80   :  { %v85_v27 = vmul.f32 %v1100_v15, %v37_v26  ;;  %v51_v44 = vpop.permute.xlu1 %50 }
  0x81   :  { %v87_v45 = vmul.f32 %v1100_v15, %v51_v44 }
  0x82   :  { %v97_v28 = vadd.f32 %v1106_v18, %v85_v27 }
  0x83   :  { %v99_v46 = vadd.f32 %v1106_v18, %v87_v45  ;;  %v58_v53 = vpop.permute.xlu0 %57 }
  0x84   :  { %v88_v54 = vmul.f32 %v1100_v15, %v58_v53  ;;  %v65_v62 = vpop.permute.xlu1 %64 }
  0x85   :  { %v89_v63 = vmul.f32 %v1100_v15, %v65_v62 }
  0x86   :  { %v100_v55 = vadd.f32 %v1106_v18, %v88_v54 }
  0x87   :  { %v101_v0 = vadd.f32 %v1106_v18, %v89_v63  ;;  %v72_v11 = vpop.permute.xlu0 %71 }
  0x88   :  { %v90_v12 = vmul.f32 %v1100_v15, %v72_v11 }
  0x8a   :  { %v102_v13 = vadd.f32 %v1106_v18, %v90_v12 }
  0xde   :  { %v174_v20 = vpop.f32.mrb[0].mxu0 }
  0xdf   :  { %v178_v21 = vadd.f32 %v174_v20, %v96_v19  ;;  %v859_v22 = vpop.f32.mrb[1].mxu0 }
  0xe1   :  { %1005 = vtanh.f32 %v178_v21  ;;  %v708_v21 = vld [vmem:[%s1196_s3 + $0x18] sm:$0xff] }
  0xeb   :  { %v1006_v23 = vpop.eup %1005 }
  0xec   :  { %869 = vmatmul.mubr.msk.f32.vlgmr.msra.gmra.mrb[0].mxu1 %vm104_vm1, %v1006_v23 }
  0xed   :  { %968 = vmatpush3.bf16.msra.mxu1 %v1061_v6  ;;  %890 = vmatprep.mubr.msk.f32.mxu1 %vm1022_vm0, %v1023_v5 }
  0xee   :  { %969 = vmatprep.subr.bf16.mxu1 %v1021_v1 }
  0xf1   :  { %971 = vmatpush3.bf16.msra.mxu1 %v1077_v10 }
  0xf2   :  { %978 = vmatprep.subr.bf16.mxu1 %v1021_v1 }
 0x1bf   :  { %v249_v29 = vpop.f32.mrb[0].mxu1 }
 0x1c0   :  { %v253_v30 = vadd.f32 %v249_v29, %v97_v28  ;;  %v870_v31 = vpop.f32.mrb[1].mxu1 }
 0x1c2   :  { %1007 = vtanh.f32 %v253_v30  ;;  %v802_v30 = vld [vmem:[%s1196_s3 + $0x20] ss:$0 sm:$0xff] }
 0x1cc   :  { %v1008_v32 = vpop.eup %1007 }
 0x1cd   :  { %880 = vmatmul.mubr.msk.f32.vlgmr.msra.gmra.mrb[2].mxu0 %vm104_vm1, %v1008_v32 }
 0x1ce   :  { %974 = vmatpush3.bf16.msra.mxu0 %v1061_v6  ;;  %901 = vmatprep.mubr.msk.f32.mxu0 %vm1022_vm0, %v1023_v5 }
 0x1cf   :  { %975 = vmatprep.subr.bf16.mxu0 %v1021_v1 }
 0x1d2   :  { %977 = vmatpush3.bf16.msra.mxu0 %v1077_v10 }
 0x1d3   :  { %984 = vmatprep.subr.bf16.mxu0 %v1021_v1 }
 0x2a0   :  { %v324_v38 = vpop.f32.mrb[2].mxu0 }
 0x2a1   :  { %v328_v39 = vadd.f32 %v324_v38, %v98_v37  ;;  %v881_v40 = vpop.f32.mrb[3].mxu0 }
 0x2a3   :  { %1009 = vtanh.f32 %v328_v39 }
 0x2ad   :  { %v1010_v41 = vpop.eup %1009 }
 0x2ae   :  { %891 = vmatmul.mubr.msk.f32.vlgmr.msra.gmra.mrb[2].mxu1 %vm104_vm1, %v1010_v41 }
 0x2af   :  { %980 = vmatpush3.bf16.msra.mxu1 %v1061_v6  ;;  %912 = vmatprep.mubr.msk.f32.mxu1 %vm1022_vm0, %v1023_v5 }
 0x2b0   :  { %981 = vmatprep.subr.bf16.mxu1 %v1021_v1 }
 0x2b3   :  { %983 = vmatpush3.bf16.msra.mxu1 %v1077_v10 }
 0x2b4   :  { %990 = vmatprep.subr.bf16.mxu1 %v1021_v1 }
 0x381   :  { %v399_v47 = vpop.f32.mrb[2].mxu1 }
 0x382   :  { %v403_v48 = vadd.f32 %v399_v47, %v99_v46  ;;  %v892_v49 = vpop.f32.mrb[3].mxu1 }
 0x384   :  { %1011 = vtanh.f32 %v403_v48 }
 0x38e   :  { %v1012_v50 = vpop.eup %1011 }
 0x38f   :  { %902 = vmatmul.mubr.msk.f32.vlgmr.msra.gmra.mrb[4].mxu0 %vm104_vm1, %v1012_v50 }
 0x390   :  { %986 = vmatpush3.bf16.msra.mxu0 %v1061_v6  ;;  %923 = vmatprep.mubr.msk.f32.mxu0 %vm1022_vm0, %v1023_v5 }
 0x391   :  { %987 = vmatprep.subr.bf16.mxu0 %v1021_v1 }
 0x394   :  { %989 = vmatpush3.bf16.msra.mxu0 %v1077_v10 }
 0x395   :  { %996 = vmatprep.subr.bf16.mxu0 %v1021_v1 }
 0x462   :  { %v474_v56 = vpop.f32.mrb[4].mxu0 }
 0x463   :  { %v478_v57 = vadd.f32 %v474_v56, %v100_v55  ;;  %v903_v58 = vpop.f32.mrb[5].mxu0 }
 0x465   :  { %1013 = vtanh.f32 %v478_v57 }
 0x46f   :  { %v1014_v59 = vpop.eup %1013 }
 0x470   :  { %913 = vmatmul.mubr.msk.f32.vlgmr.msra.gmra.mrb[4].mxu1 %vm104_vm1, %v1014_v59 }
 0x471   :  { %992 = vmatpush3.bf16.msra.mxu1 %v1061_v6  ;;  %934 = vmatprep.mubr.msk.f32.mxu1 %vm1022_vm0, %v1023_v5 }
 0x472   :  { %993 = vmatprep.subr.bf16.mxu1 %v1021_v1 }
 0x475   :  { %995 = vmatpush3.bf16.msra.mxu1 %v1077_v10  ;;  %v76_v10 = vrot.slane %v1074_v9, %v75_v7  ;;  %v707_v9 = vld [vmem:[%s1196_s3 + $0x10] sm:$0xff] }
 0x476   :  { %v1000_v22 = vpack.c.bf16 %v708_v21, %v707_v9 }
 0x477   :  { %78 = vbcast.lane.b32.xlu1 %v76_v10, 256 }
 0x4e9   :  { %v79_v23 = vpop.permute.xlu1 %78 }
 0x4ea   :  { %v91_v24 = vmul.f32 %v1100_v15, %v79_v23 }
 0x4ec   :  { %v103_v25 = vadd.f32 %v1106_v18, %v91_v24 }
 0x543   :  { %v549_v2 = vpop.f32.mrb[4].mxu1 }
 0x544   :  { %v553_v3 = vadd.f32 %v549_v2, %v101_v0  ;;  %v914_v4 = vpop.f32.mrb[5].mxu1 }
 0x546   :  { %1015 = vtanh.f32 %v553_v3 }
 0x550   :  { %v1016_v6 = vpop.eup %1015 }
 0x551   :  { %924 = vmatmul.mubr.msk.f32.vlgmr.msra.gmra.mrb[6].mxu0 %vm104_vm1, %v1016_v6 }
 0x552   :  { %945 = vmatprep.mubr.msk.f32.mxu0 %vm1022_vm0, %v1023_v5  ;;  %v705_v5 = vld [vmem:[%s1196_s3] sm:$0xff] }
 0x553   :  { %v997_v20 = vpack.c.bf16 %v706_v8, %v705_v5 }
 0x555   :  { %998 = vmatpush3.bf16.msra.mxu0 %v997_v20 }
 0x556   :  { %999 = vmatprep.subr.bf16.mxu0 %v1021_v1 }
 0x559   :  { %1001 = vmatpush3.bf16.msra.mxu0 %v1000_v22 }
 0x624   :  { %v624_v14 = vpop.f32.mrb[6].mxu0 }
 0x625   :  { %v628_v16 = vadd.f32 %v624_v14, %v102_v13  ;;  %v925_v17 = vpop.f32.mrb[7].mxu0 }
 0x627   :  { %1017 = vtanh.f32 %v628_v16 }
 0x631   :  { %v1018_v19 = vpop.eup %1017 }
 0x632   :  { %935 = vmatmul.mubr.msk.f32.vlgmr.msra.gmra.mrb[6].mxu1 %vm104_vm1, %v1018_v19 }
 0x705   :  { %v699_v26 = vpop.f32.mrb[6].mxu1 }
 0x706   :  { %v703_v27 = vadd.f32 %v699_v26, %v103_v25  ;;  %v936_v28 = vpop.f32.mrb[7].mxu1 }
 0x708   :  { %1019 = vtanh.f32 %v703_v27 }
 0x712   :  { %v1020_v29 = vpop.eup %1019 }
 0x713   :  { %946 = vmatmul.mubr.msk.f32.vlgmr.msra.gmra.mrb[8].mxu0 %vm104_vm1, %v1020_v29 }
 0x7e6   :  { %v783_v31 = vpop.f32.mrb[8].mxu0 }
 0x7e7   :  { %v784_v1 = vadd.f32 %v802_v30, %v783_v31  ;;  %v947_v32 = vpop.f32.mrb[9].mxu0 }
 0x7e9   :  { %788 = vst.msk [vmem:[%s1197_s4] sm:$0xff] %vm787_vm2, %v784_v1 }

</bundles_post_ra>
